<compile_context>
chip_gen: v6e
topology: v6e:2x2x1
jax: 0.10.0
libtpu: 0.0.40
codegen_flags: <defaults>
</compile_context>

<pallas_src>
import functools

import jax
import jax.numpy as jnp
from jax import lax
from jax.experimental import pallas as pl
from jax.experimental.pallas import tpu as pltpu

TEMPERATURE = 0.5
_EPS = 1e-8  # torch.nn.functional.cosine_similarity eps


def _cdiv(a, b):
    return (a + b - 1) // b


def _round_up(x, m):
    return _cdiv(x, m) * m


def _vmem_budgets():
    """Returns (working-set budget for tile sizing, vmem_limit_bytes) per generation."""
    try:
        vmem_cap = int(pltpu.get_tpu_info().vmem_capacity_bytes)
    except Exception:
        vmem_cap = 64 * 1024 * 1024  # unknown target: assume the tightest (v7x-like)
    if vmem_cap >= 128 * 1024 * 1024:            # v5e / v6e: 128 MiB physical VMEM
        return 48 * 1024 * 1024, 96 * 1024 * 1024
    return 22 * 1024 * 1024, 44 * 1024 * 1024    # v7x: 64 MiB per TensorCore


def _supcon_row_kernel(anchor_ref, refs_ref, labels_ref, out_ref, *, b_actual, temperature):
    """One batch tile: anchor (tb,1,d), references (tb,r,d), labels (tb,r) -> loss (tb,1)."""
    a32 = anchor_ref[...].astype(jnp.float32)            # small (tb, 1, d) tile
    lab = labels_ref[...]                                  # (tb, r) int32
    tb = out_ref.shape[0]

    # Single fused sweep over the big (tb, r, d) tile: the f32 cast is folded into the
    # product expressions so Mosaic can fuse convert + multiply into the lane reduces;
    # dots and |r|^2 come out of the same pass (no second sweep, no MXU push/pop of
    # degenerate N=1 matmuls).
    r32 = refs_ref[...].astype(jnp.float32)
    dots = jnp.sum(r32 * a32, axis=-1)                    # (tb, r)   sum_d r*a
    r_sq = jnp.sum(r32 * r32, axis=-1)                    # (tb, r)   sum_d r*r
    a_sq = jnp.sum(a32 * a32, axis=-1)                    # (tb, 1)

    # Cosine similarity / temperature; per-norm eps clamp (torch cosine_similarity).
    # The three divides are fused into one reciprocal: approximate EUP vrcp when the
    # inputs are already bf16-quantised, exact when they are f32.
    a_norm = jnp.maximum(jnp.sqrt(a_sq), _EPS)            # (tb, 1)
    r_norm = jnp.maximum(jnp.sqrt(r_sq), _EPS)            # (tb, r)
    approx = refs_ref.dtype != jnp.float32
    inv_denom = pl.reciprocal(a_norm * r_norm * temperature, approx=approx)
    sim = dots * inv_denom                                 # (tb, r)

    pos_mask = lab == 1
    valid_mask = lab >= 0                                  # positives or negatives (pad = -1)
    pos_count = jnp.sum(pos_mask.astype(jnp.float32), axis=-1, keepdims=True)   # (tb, 1)

    # Row-max subtraction (detached in torch -> forward value unchanged).  Like the
    # module, the max is taken over ALL r entries, including label == -1 ones.
    sim = sim - jnp.max(sim, axis=-1, keepdims=True)

    sum_pos = jnp.sum(jnp.where(pos_mask, sim, 0.0), axis=-1, keepdims=True)     # (tb, 1)
    exp_total = jnp.sum(jnp.where(valid_mask, jnp.exp(sim), 0.0),
                        axis=-1, keepdims=True)                                  # (tb, 1)

    # Batch-padding rows are clamped so dead lanes never produce NaN/Inf; real rows
    # with pos_count == 0 still give NaN, matching the module's own definition.
    row_idx = pl.program_id(0) * tb + lax.broadcasted_iota(jnp.int32, (tb, 1), 0)
    row_valid = row_idx < b_actual
    exp_total = jnp.where(row_valid, exp_total, 1.0)
    pos_count = jnp.where(row_valid, pos_count, 1.0)

    # -1/n * (sum_pos - n*log(exp_total)) == log(exp_total) - sum_pos / n
    loss = jnp.log(exp_total) - sum_pos * pl.reciprocal(pos_count, approx=False)
    out_ref[...] = jnp.where(row_valid, loss, 0.0)


def supcon_loss(anchor, references, labels, temperature=TEMPERATURE,
                compute_dtype=jnp.bfloat16):
    """anchor (B,1,D), references (B,R,D), labels (B,R) -> scalar mean loss.

    compute_dtype is the at-rest / DMA dtype of anchor & references (bf16 by default
    to halve HBM traffic for this bandwidth-bound op); in-kernel math accumulates f32.
    """
    b, _, d = anchor.shape
    r = references.shape[1]

    # Cast only if needed (no-op when the caller already stores bf16 activations).
    a = anchor if anchor.dtype == compute_dtype else anchor.astype(compute_dtype)
    refs = references if references.dtype == compute_dtype else references.astype(compute_dtype)
    lab = labels if labels.dtype == jnp.int32 else labels.astype(jnp.int32)

    in_bytes = jnp.dtype(compute_dtype).itemsize
    working_budget, vmem_limit = _vmem_budgets()

    # Everything resident per batch row: double-buffered refs / anchor / labels blocks,
    # the worst-case f32 product temporary, and the (r,)-wide f32 intermediates.
    per_row = (2 * r * d * in_bytes       # references block, double-buffered
               + 2 * d * in_bytes         # anchor block, double-buffered
               + 2 * r * 4                # labels block (int32), double-buffered
               + r * d * 4                # possible fused-sweep f32 temporary
               + 8 * r * 4                # dots / r_sq / sim / exp / masks
               + 256)                     # per-row scalars & output
    tb_cap = max(8, int(working_budget // per_row) // 8 * 8)
    # TODO(synk): add an R-chunked (online-logsumexp) grid axis for very large R*D
    # where even a (8, R, D) block exceeds the per-buffer budget.

    # Aim for >=4 grid steps on large batches (DMA/compute overlap + both v7x cores),
    # but never split a batch that fits in one block (avoids any batch-dim padding).
    tb = max(8, min(tb_cap, _round_up(_cdiv(b, 4), 8)))
    if b <= tb:
        tb, bp = b, b                      # single block: no padding, no HBM copies
    else:
        bp = _round_up(b, tb)
        if bp != b:                        # pad the batch dim only (R and D never are)
            a = jnp.pad(a, ((0, bp - b), (0, 0), (0, 0)))
            refs = jnp.pad(refs, ((0, bp - b), (0, 0), (0, 0)))
            lab = jnp.pad(lab, ((0, bp - b), (0, 0)), constant_values=-1)

    kernel = functools.partial(_supcon_row_kernel, b_actual=b,
                               temperature=float(temperature))

    row_losses = pl.pallas_call(
        kernel,
        out_shape=jax.ShapeDtypeStruct((bp, 1), jnp.float32),
        grid=(bp // tb,),
        in_specs=[
            pl.BlockSpec((tb, 1, d), lambda i: (i, 0, 0)),   # anchor
            pl.BlockSpec((tb, r, d), lambda i: (i, 0, 0)),   # references (full R, full D)
            pl.BlockSpec((tb, r), lambda i: (i, 0)),         # labels
        ],
        out_specs=pl.BlockSpec((tb, 1), lambda i: (i, 0)),
        compiler_params=pltpu.CompilerParams(
            dimension_semantics=("parallel",),               # independent rows -> megacore
            vmem_limit_bytes=vmem_limit,
        ),
    )(a, refs, lab)

    # Padded rows were zeroed in-kernel, so the batch mean is just sum / B.
    return jnp.sum(row_losses) / b


def _supcon_loss_ref(anchor, references, labels, temperature=TEMPERATURE):
    """Pure-JAX f32 reference mirroring the PyTorch module."""
    a = jnp.squeeze(anchor, axis=1).astype(jnp.float32)
    refs = references.astype(jnp.float32)
    a_norm = jnp.maximum(jnp.linalg.norm(a, axis=-1, keepdims=True), _EPS)
    r_norm = jnp.maximum(jnp.linalg.norm(refs, axis=-1), _EPS)
    dots = jnp.sum(a[:, None, :] * refs, axis=-1)
    sim = dots / (a_norm * r_norm) / temperature
    pos_mask = labels == 1
    neg_mask = labels == 0
    pos_count = jnp.sum(pos_mask, axis=-1).astype(jnp.float32)
    sim = sim - jnp.max(sim, axis=-1, keepdims=True)
    sum_pos = jnp.sum(jnp.where(pos_mask, sim, 0.0), axis=-1)
    exp_total = jnp.sum(jnp.where(pos_mask | neg_mask, jnp.exp(sim), 0.0), axis=-1)
    loss = (-1.0 / pos_count) * (sum_pos - pos_count * jnp.log(exp_total))
    return jnp.mean(loss)


if __name__ == "__main__":
    B, R, D = 2, 8, 32
    key = jax.random.PRNGKey(0)
    k1, k2, k3 = jax.random.split(key, 3)

    anchor = jax.random.normal(k1, (B, 1, D), dtype=jnp.float32)
    references = jax.random.normal(k2, (B, R, D), dtype=jnp.float32)
    labels = jax.random.randint(k3, (B, R), -1, 2, dtype=jnp.int32)
    # Rows with no positive are NaN by the module's own definition; avoid in the test.
    labels = labels.at[:, 0].set(1)
    labels = labels.at[:, 1].set(0)

    # f32 at-rest path: tight check against the PyTorch-equivalent reference.
    loss_f32 = jax.block_until_ready(
        supcon_loss(anchor, references, labels, compute_dtype=jnp.float32))
    ref_f32 = jax.block_until_ready(_supcon_loss_ref(anchor, references, labels))
    assert jnp.allclose(loss_f32, ref_f32, rtol=1e-3, atol=1e-3), (loss_f32, ref_f32)

    # Default bf16 at-rest path (half the HBM traffic): dtype-aware comparison against
    # the reference evaluated on identically bf16-quantised inputs.
    a_q = anchor.astype(jnp.bfloat16).astype(jnp.float32)
    r_q = references.astype(jnp.bfloat16).astype(jnp.float32)
    loss_bf16 = jax.block_until_ready(supcon_loss(anchor, references, labels))
    ref_bf16 = jax.block_until_ready(_supcon_loss_ref(a_q, r_q, labels))
    assert jnp.allclose(loss_bf16, ref_bf16, rtol=5e-3, atol=5e-3), (loss_bf16, ref_bf16)

    print("KERNEL_OK")
</pallas_src>

<mosaic_0001>
module attributes {stable_mosaic.version = 11 : i64} {
  func.func @_supcon_row_kernel(%arg0: i32, %arg1: memref<2x1x32xf32, #tpu.memory_space<vmem>>, %arg2: memref<2x8x32xf32, #tpu.memory_space<vmem>>, %arg3: memref<2x8xi32, #tpu.memory_space<vmem>>, %arg4: memref<2x1xf32, #tpu.memory_space<vmem>>) attributes {dimension_semantics = [#tpu.dimension_semantics<parallel>], iteration_bounds = array<i64: 1>, scalar_prefetch = 0 : i64, scratch_operands = 0 : i64, tpu.core_type = #tpu.core_type<tc>, window_params = [{transform_indices = @transform_0, window_bounds = array<i64: 2, 1, 32>}, {transform_indices = @transform_1, window_bounds = array<i64: 2, 8, 32>}, {transform_indices = @transform_2, window_bounds = array<i64: 2, 8>}, {transform_indices = @transform_3, window_bounds = array<i64: 2, 1>}]} {
    %c0 = arith.constant 0 : index
    %c0_0 = arith.constant 0 : index
    %c0_1 = arith.constant 0 : index
    %0 = vector.load %arg1[%c0, %c0_0, %c0_1] : memref<2x1x32xf32, #tpu.memory_space<vmem>>, vector<2x1x32xf32>
    %c0_2 = arith.constant 0 : index
    %c0_3 = arith.constant 0 : index
    %1 = vector.load %arg3[%c0_2, %c0_3] : memref<2x8xi32, #tpu.memory_space<vmem>>, vector<2x8xi32>
    %c0_4 = arith.constant 0 : index
    %c0_5 = arith.constant 0 : index
    %c0_6 = arith.constant 0 : index
    %2 = vector.load %arg2[%c0_4, %c0_5, %c0_6] : memref<2x8x32xf32, #tpu.memory_space<vmem>>, vector<2x8x32xf32>
    %3 = vector.broadcast %0 : vector<2x1x32xf32> to vector<2x8x32xf32>
    %4 = arith.mulf %2, %3 : vector<2x8x32xf32>
    %cst = arith.constant dense<0.000000e+00> : vector<2x8xf32>
    %5 = vector.multi_reduction <add>, %4, %cst [2] : vector<2x8x32xf32> to vector<2x8xf32>
    %6 = arith.mulf %2, %2 : vector<2x8x32xf32>
    %cst_7 = arith.constant dense<0.000000e+00> : vector<2x8xf32>
    %7 = vector.multi_reduction <add>, %6, %cst_7 [2] : vector<2x8x32xf32> to vector<2x8xf32>
    %8 = arith.mulf %0, %0 : vector<2x1x32xf32>
    %cst_8 = arith.constant dense<0.000000e+00> : vector<2x1xf32>
    %9 = vector.multi_reduction <add>, %8, %cst_8 [2] : vector<2x1x32xf32> to vector<2x1xf32>
    %10 = math.sqrt %9 : vector<2x1xf32>
    %cst_9 = arith.constant 9.99999993E-9 : f32
    %11 = vector.broadcast %cst_9 : f32 to vector<2x1xf32>
    %12 = arith.maximumf %10, %11 : vector<2x1xf32>
    %13 = math.sqrt %7 : vector<2x8xf32>
    %cst_10 = arith.constant 9.99999993E-9 : f32
    %14 = vector.broadcast %cst_10 : f32 to vector<2x8xf32>
    %15 = arith.maximumf %13, %14 : vector<2x8xf32>
    %16 = vector.broadcast %12 : vector<2x1xf32> to vector<2x8xf32>
    %17 = arith.mulf %16, %15 : vector<2x8xf32>
    %cst_11 = arith.constant 5.000000e-01 : f32
    %18 = vector.broadcast %cst_11 : f32 to vector<2x8xf32>
    %19 = arith.mulf %17, %18 : vector<2x8xf32>
    %20 = tpu.reciprocal %19 : vector<2x8xf32> -> vector<2x8xf32>
    %21 = arith.mulf %5, %20 : vector<2x8xf32>
    %c1_i32 = arith.constant 1 : i32
    %22 = vector.broadcast %c1_i32 : i32 to vector<2x8xi32>
    %23 = arith.cmpi eq, %1, %22 : vector<2x8xi32>
    %c0_i32 = arith.constant 0 : i32
    %24 = vector.broadcast %c0_i32 : i32 to vector<2x8xi32>
    %25 = arith.cmpi sge, %1, %24 : vector<2x8xi32>
    %26 = arith.extui %23 : vector<2x8xi1> to vector<2x8xi32>
    %27 = arith.sitofp %26 : vector<2x8xi32> to vector<2x8xf32>
    %cst_12 = arith.constant dense<0.000000e+00> : vector<2xf32>
    %28 = vector.multi_reduction <add>, %27, %cst_12 [1] : vector<2x8xf32> to vector<2xf32>
    %29 = vector.shape_cast %28 : vector<2xf32> to vector<2x1xf32>
    %cst_13 = arith.constant dense<0xFF800000> : vector<2xf32>
    %30 = vector.multi_reduction <maximumf>, %21, %cst_13 [1] : vector<2x8xf32> to vector<2xf32>
    %31 = vector.shape_cast %30 : vector<2xf32> to vector<2x1xf32>
    %32 = vector.broadcast %31 : vector<2x1xf32> to vector<2x8xf32>
    %33 = arith.subf %21, %32 : vector<2x8xf32>
    %cst_14 = arith.constant 0.000000e+00 : f32
    %34 = vector.broadcast %cst_14 : f32 to vector<2x8xf32>
    %35 = arith.select %23, %33, %34 : vector<2x8xi1>, vector<2x8xf32>
    %cst_15 = arith.constant dense<0.000000e+00> : vector<2xf32>
    %36 = vector.multi_reduction <add>, %35, %cst_15 [1] : vector<2x8xf32> to vector<2xf32>
    %37 = vector.shape_cast %36 : vector<2xf32> to vector<2x1xf32>
    %38 = math.exp %33 : vector<2x8xf32>
    %cst_16 = arith.constant 0.000000e+00 : f32
    %39 = vector.broadcast %cst_16 : f32 to vector<2x8xf32>
    %40 = arith.select %25, %38, %39 : vector<2x8xi1>, vector<2x8xf32>
    %cst_17 = arith.constant dense<0.000000e+00> : vector<2xf32>
    %41 = vector.multi_reduction <add>, %40, %cst_17 [1] : vector<2x8xf32> to vector<2xf32>
    %42 = vector.shape_cast %41 : vector<2xf32> to vector<2x1xf32>
    %c2_i32 = arith.constant 2 : i32
    %43 = arith.muli %arg0, %c2_i32 : i32
    %44 = tpu.iota {dimensions = array<i32: 0>} : vector<2x1xi32>
    %45 = vector.broadcast %43 : i32 to vector<2x1xi32>
    %46 = arith.addi %45, %44 : vector<2x1xi32>
    %c2_i32_18 = arith.constant 2 : i32
    %47 = vector.broadcast %c2_i32_18 : i32 to vector<2x1xi32>
    %48 = arith.cmpi slt, %46, %47 : vector<2x1xi32>
    %cst_19 = arith.constant 1.000000e+00 : f32
    %49 = vector.broadcast %cst_19 : f32 to vector<2x1xf32>
    %50 = arith.select %48, %42, %49 : vector<2x1xi1>, vector<2x1xf32>
    %cst_20 = arith.constant 1.000000e+00 : f32
    %51 = vector.broadcast %cst_20 : f32 to vector<2x1xf32>
    %52 = arith.select %48, %29, %51 : vector<2x1xi1>, vector<2x1xf32>
    %53 = math.log %50 : vector<2x1xf32>
    %54 = tpu.reciprocal %52 : vector<2x1xf32> -> vector<2x1xf32>
    %55 = arith.mulf %37, %54 : vector<2x1xf32>
    %56 = arith.subf %53, %55 : vector<2x1xf32>
    %cst_21 = arith.constant 0.000000e+00 : f32
    %57 = vector.broadcast %cst_21 : f32 to vector<2x1xf32>
    %58 = arith.select %48, %56, %57 : vector<2x1xi1>, vector<2x1xf32>
    %c0_22 = arith.constant 0 : index
    %c0_23 = arith.constant 0 : index
    %59 = vector.load %arg4[%c0_22, %c0_23] : memref<2x1xf32, #tpu.memory_space<vmem>>, vector<2x1xf32>
    tpu.vector_store %arg4[%c0_22, %c0_23], %58 {strides = array<i32>} : memref<2x1xf32, #tpu.memory_space<vmem>>, vector<2x1xf32>,
    return
  }
  func.func @transform_0(%arg0: i32) -> (i32, i32, i32) {
    %c0_i32 = arith.constant 0 : i32
    %c0_i32_0 = arith.constant 0 : i32
    %c0_i32_1 = arith.constant 0 : i32
    return %arg0, %c0_i32, %c0_i32_0 : i32, i32, i32
  }
  func.func @transform_1(%arg0: i32) -> (i32, i32, i32) {
    %c0_i32 = arith.constant 0 : i32
    %c0_i32_0 = arith.constant 0 : i32
    %c0_i32_1 = arith.constant 0 : i32
    return %arg0, %c0_i32, %c0_i32_0 : i32, i32, i32
  }
  func.func @transform_2(%arg0: i32) -> (i32, i32) {
    %c0_i32 = arith.constant 0 : i32
    %c0_i32_0 = arith.constant 0 : i32
    return %arg0, %c0_i32 : i32, i32
  }
  func.func @transform_3(%arg0: i32) -> (i32, i32) {
    %c0_i32 = arith.constant 0 : i32
    %c0_i32_0 = arith.constant 0 : i32
    return %arg0, %c0_i32 : i32, i32
  }
}

</mosaic_0001>

<bundles_post_ra>
// kernel: tpu_custom_call.1
= control target key start
LH: loop header
LB: loop body
LE: loop exit
PB: predicated region body
PF: predicated region fallthrough
CT: control target
= control target key end

     0   :  { %8 = vsyncpa [#allocation3], 0  ;;  %s385_s0 = inlined_call_operand.hbm [shape: f32[2,1,32], index: 0, kind: input, shape index: {}]   ;;  %s386_s1 = inlined_call_operand.hbm [shape: f32[2,8,32], index: 1, kind: input, shape index: {}]   ;;  %s387_s2 = inlined_call_operand.vmem [shape: s32[2,8], index: 2, kind: input, shape index: {}]   ;;  %s388_s3 = inlined_call_operand.vmem [shape: f32[2,1], index: 3, kind: output, shape index: {}]  }
   0x1   :  { %9 = vsyncpa [#allocation5], 0  ;;  %s317_s12 = smov [#allocation2]  }
   0x2   :  { %s15_s13 = sshll.u32 %s317_s12, 4  ;;  %s16_s13 = int_to_ptr.vmem [resolvable:$true] %s15_s13 }
   0x3   :  { %s281_s14 = scalar_lea.vmem %s16_s13, 32  ;;  %p286_p1 = scmp.lt.s32.totalorder %s16_s13, %s16_s13 }
   0x4   :  { %p282_p0 = scmp.ne.s32.totalorder %s16_s13, %s281_s14  ;;  %p287_p2 = scmp.lt.s32.totalorder %s281_s14, %s281_s14 }
   0x6   :  { %p288_p3 = por %p287_p2, %p286_p1 }
   0x8   :  { %p289_p4 = pnand %p288_p3, %p282_p0 }
   0xa   :  { %292 = shalt.err (!%p289_p4)
}
   0xb   :  { %s318_s15 = smov 16   ;;  %s319_s16 = smov 1  }
   0xc   :  { %21 = dma.hbm_to_vmem [thread:$0]  %s385_s0, 32, %s16_s13, [#allocation3], %s318_s15, %s318_s15, %s319_s16  }
   0xd   :  { %s320_s19 = smov [#allocation4]  }
   0xe   :  { %s27_s20 = sshll.u32 %s320_s19, 4  ;;  %s28_s20 = int_to_ptr.vmem [resolvable:$true] %s27_s20 }
   0xf   :  { %s301_s21 = scalar_lea.vmem %s28_s20, 256  ;;  %p306_p6 = scmp.lt.s32.totalorder %s28_s20, %s28_s20 }
  0x10   :  { %p302_p5 = scmp.ne.s32.totalorder %s28_s20, %s301_s21  ;;  %p307_p7 = scmp.lt.s32.totalorder %s301_s21, %s301_s21 }
  0x12   :  { %p308_p8 = por %p307_p7, %p306_p6 }
  0x14   :  { %p309_p9 = pnand %p308_p8, %p302_p5 }
  0x16   :  { %312 = shalt.err (!%p309_p9)
}
  0x17   :  { %s321_s22 = smov 128   ;;  %s322_s23 = smov 8  }
  0x18   :  { %33 = dma.hbm_to_vmem [thread:$0]  %s386_s1, 256, %s28_s20, [#allocation5], %s321_s22, %s321_s22, %s322_s23  }
  0x19   :  { %313 = dma.done.wait [#allocation3], 32  }
  0x1a   :  { %314 = vsyncadd [#allocation3], 4294967264 }
  0x1b   :  { %315 = dma.done.wait [#allocation5], 256  }
  0x1c   :  { %316 = vsyncadd [#allocation5], 4294967040  ;;  %v49_v0 = vlaneseq  ;;  %v45_v3 = vld [vmem:[#allocation4] sm:$0xff]  ;;  %vm61_vm0 = vcmask 261120   ;;  %v42_v4 = vld [vmem:[#allocation2] sm:$0x1] }
  0x1d   :  { %vm78_vm1 = vcmask 253952   ;;  %v46_v5 = vld [vmem:[#allocation4 + $0x8] sm:$0xff]  ;;  %v68_v6 = vmul.f32 %v45_v3, %v45_v3  ;;  %v76_v7 = vmul.f32 %v42_v4, %v42_v4  ;;  %v43_v10 = vld [vmem:[#allocation2 + $0x1] sm:$0x1]  ;;  %vm153_vm10 = vcmask 1041409  }
  0x1e   :  { %v352_v1 = vshrl.u32 %v49_v0, 7  ;;  %v69_v9 = vmul.f32 %v46_v5, %v46_v5  ;;  %v77_v11 = vmul.f32 %v43_v10, %v43_v10  ;;  %v144_v55 = vand.u32 127, %v49_v0 }
  0x1f   :  { %v70_v13 = vsel %vm61_vm0, %v68_v6, 0.0  ;;  %v79_v14 = vsel %vm78_vm1, %v76_v7, 0.0  ;;  %vm137_vm11 = vcmask 58368   ;;  %v323_v6 = vmov 0  }
  0x20   :  { %v355_v2 = vsub.s32 0, %v352_v1  ;;  %71 = vadd.xlane.f32.xlu1 %v70_v13  ;;  %80 = vadd.xlane.f32.xlu0 %v79_v14  ;;  %v73_v15 = vsel %vm61_vm0, %v69_v9, 0.0  ;;  %v82_v16 = vsel %vm78_vm1, %v77_v11, 0.0  ;;  %v147_v59 = vsub.s32 %v144_v55, %v352_v1 }
  0x21   :  { %252 = vset.pattern.permute.xlu0 %v323_v6  ;;  %251 = vset.pattern.permute.xlu1 %v323_v6  ;;  %v166_v0 = vsub.s32 1, %v352_v1  ;;  %vm225_vm14 = vcmp.lt.s32.totalorder %v352_v1, 2  ;;  %vm234_vm15 = vcmask 1024  }
  0x22   :  { %v52_v8 = vrot.slane %v42_v4, %v355_v2  ;;  %v56_v12 = vrot.slane %v43_v10, %v355_v2 }
  0x24   :  { %v59_v17 = vmul.f32 %v52_v8, %v45_v3  ;;  %v60_v18 = vmul.f32 %v56_v12, %v46_v5  ;;  %74 = vadd.xlane.f32.xlu1 %v73_v15  ;;  %83 = vadd.xlane.f32.xlu0 %v82_v16  ;;  %v44_v16 = vld [vmem:[%s387_s2] sm:$0x3] }
  0x25   :  { %vm133_vm12 = vcmp.eq.s32.totalorder %v44_v16, 1  ;;  %vm134_vm13 = vcmp.ge.s32.totalorder %v44_v16, 0 }
  0x26   :  { %v62_v19 = vsel %vm61_vm0, %v59_v17, 0.0  ;;  %v65_v20 = vsel %vm61_vm0, %v60_v18, 0.0  ;;  %v324_v17 = vmov 0.0  }
  0x28   :  { %63 = vadd.xlane.f32.xlu0 %v62_v19  ;;  %66 = vadd.xlane.f32.xlu1 %v65_v20 }
  0xa9   :  { %v72_v21 = vpop.xlane.xlu1 %71  ;;  %v81_v22 = vpop.xlane.xlu0 %80 }
  0xaa   :  { %253 = vrsqrt.f32 %v72_v21  ;;  %vm103_vm2 = vcmp.eq.f32.partialorder %v72_v21, inf  ;;  %v106_v30 = vand.u32 2147483648, %v72_v21  ;;  %vm87_vm3 = vcmp.eq.f32.partialorder %v81_v22, inf }
  0xab   :  { %255 = vrsqrt.f32 %v81_v22  ;;  %v90_v31 = vand.u32 2147483648, %v81_v22  ;;  %vm105_vm4 = vcmp.eq.f32.partialorder %v72_v21, 0.0  ;;  %vm89_vm5 = vcmp.eq.f32.partialorder %v81_v22, 0.0 }
  0xad   :  { %v75_v23 = vpop.xlane.xlu1 %74  ;;  %v84_v24 = vpop.xlane.xlu0 %83 }
  0xae   :  { %257 = vrsqrt.f32 %v75_v23  ;;  %vm110_vm6 = vcmp.eq.f32.partialorder %v75_v23, inf  ;;  %vm112_vm7 = vcmp.eq.f32.partialorder %v75_v23, 0.0  ;;  %v113_v41 = vand.u32 2147483648, %v75_v23 }
  0xaf   :  { %259 = vrsqrt.f32 %v84_v24  ;;  %vm94_vm8 = vcmp.eq.f32.partialorder %v84_v24, inf  ;;  %v97_v42 = vand.u32 2147483648, %v84_v24  ;;  %vm96_vm9 = vcmp.eq.f32.partialorder %v84_v24, 0.0 }
  0xb1   :  { %v64_v57 = vpop.xlane.xlu0 %63  ;;  %v67_v58 = vpop.xlane.xlu1 %66 }
  0xb7   :  { %v254_v25 = vpop.eup %253 }
  0xb8   :  { %v256_v26 = vpop.eup %255  ;;  %v102_v27 = vmul.f32 %v254_v25, %v72_v21 }
  0xb9   :  { %v86_v28 = vmul.f32 %v256_v26, %v81_v22 }
  0xba   :  { %v104_v29 = vsel %vm103_vm2, %v72_v21, %v102_v27 }
  0xbb   :  { %v258_v32 = vpop.eup %257  ;;  %v88_v33 = vsel %vm87_vm3, %v81_v22, %v86_v28  ;;  %v107_v35 = vsel %vm105_vm4, %v106_v30, %v104_v29 }
  0xbc   :  { %v260_v34 = vpop.eup %259  ;;  %v91_v36 = vsel %vm89_vm5, %v90_v31, %v88_v33  ;;  %v109_v37 = vmul.f32 %v258_v32, %v75_v23  ;;  %v115_v43 = vmax.f32 %v107_v35, 1e-08 }
  0xbd   :  { %v99_v38 = vmax.f32 %v91_v36, 1e-08  ;;  %v93_v39 = vmul.f32 %v260_v34, %v84_v24 }
  0xbe   :  { %v111_v40 = vsel %vm110_vm6, %v75_v23, %v109_v37 }
  0xbf   :  { %v120_v44 = vrot.slane %v99_v38, %v355_v2  ;;  %v95_v45 = vsel %vm94_vm8, %v84_v24, %v93_v39  ;;  %v114_v46 = vsel %vm112_vm7, %v113_v41, %v111_v40 }
  0xc0   :  { %v98_v47 = vsel %vm96_vm9, %v97_v42, %v95_v45  ;;  %v116_v50 = vmax.f32 %v114_v46, 1e-08 }
  0xc1   :  { %v100_v48 = vmax.f32 %v98_v47, 1e-08  ;;  %v125_v49 = vmul.f32 %v120_v44, %v115_v43 }
  0xc3   :  { %v124_v51 = vrot.slane %v100_v48, %v355_v2  ;;  %v127_v52 = vmul.f32 0.5, %v125_v49 }
  0xc5   :  { %261 = vrcp.f32 %v127_v52  ;;  %v126_v53 = vmul.f32 %v124_v51, %v116_v50 }
  0xc7   :  { %v128_v54 = vmul.f32 0.5, %v126_v53 }
  0xc9   :  { %263 = vrcp.f32 %v128_v54 }
  0xd2   :  { %v262_v56 = vpop.eup %261 }
  0xd3   :  { %v131_v60 = vmul.f32 %v262_v56, %v64_v57 }
  0xd5   :  { %v148_v63 = vrot.slane %v131_v60, %v147_v59 }
  0xd6   :  { %v264_v61 = vpop.eup %263 }
  0xd7   :  { %v132_v62 = vmul.f32 %v264_v61, %v67_v58 }
  0xd9   :  { %v152_v3 = vrot.slane %v132_v62, %v147_v59 }
  0xdb   :  { %v154_v4 = vsel %vm153_vm10, %v152_v3, %v148_v63 }
  0xdc   :  { %v156_v5 = vsel %vm137_vm11, %v154_v4, -inf }
  0xdd   :  { %157 = vmax.xlane.f32.xlu0 %v156_v5 }
 0x166   :  { %v158_v7 = vpop.xlane.xlu0 %157 }
 0x167   :  { %v163_v8 = vrot.slane %v158_v7, %v355_v2  ;;  %v167_v9 = vrot.slane %v158_v7, %v166_v0  ;;  %v242_v2 = vsel %vm133_vm12, 1.0, %v324_v17 }
 0x168   :  { %v138_v18 = vsel %vm137_vm11, %v242_v2, 0.0 }
 0x169   :  { %v170_v10 = vsub.f32 %v131_v60, %v163_v8  ;;  %v171_v11 = vsub.f32 %v132_v62, %v167_v9 }
 0x16b   :  { %v194_v12 = vmul.f32 1.442695, %v170_v10  ;;  %v196_v13 = vmul.f32 1.442695, %v171_v11 }
 0x16d   :  { %265 = vpow2.f32 %v194_v12 }
 0x16e   :  { %267 = vpow2.f32 %v196_v13 }
 0x17a   :  { %v266_v14 = vpop.eup %265 }
 0x17b   :  { %v268_v15 = vpop.eup %267  ;;  %201 = vperm.xlu1 %251, %v266_v14  }
 0x17c   :  { %204 = vperm.xlu0 %252, %v268_v15  }
 0x17f   :  { %175 = vperm.xlu1 %251, %v170_v10  }
 0x183   :  { %178 = vperm.xlu1 %251, %v171_v11  }
 0x1a7   :  { %139 = vadd.xlane.f32.xlu1 %v138_v18 }
 0x1f6   :  { %v202_v19 = vpop.permute.xlu1 %201 }
 0x1f7   :  { %v205_v20 = vpop.permute.xlu0 %204  ;;  %v209_v21 = vrot.slane %v202_v19, %v147_v59 }
 0x1f8   :  { %v213_v22 = vrot.slane %v205_v20, %v147_v59 }
 0x1fa   :  { %v176_v23 = vpop.permute.xlu1 %175  ;;  %v214_v24 = vsel %vm153_vm10, %v213_v22, %v209_v21 }
 0x1fb   :  { %v216_v25 = vsel %vm134_vm13, %v214_v24, 0.0  ;;  %v183_v28 = vrot.slane %v176_v23, %v147_v59 }
 0x1fc   :  { %v217_v26 = vsel %vm137_vm11, %v216_v25, 0.0 }
 0x1fd   :  { %218 = vadd.xlane.f32.xlu0 %v217_v26 }
 0x1fe   :  { %v179_v27 = vpop.permute.xlu1 %178 }
 0x1ff   :  { %v187_v29 = vrot.slane %v179_v27, %v147_v59 }
 0x201   :  { %v188_v30 = vsel %vm153_vm10, %v187_v29, %v183_v28 }
 0x202   :  { %v190_v31 = vsel %vm133_vm12, %v188_v30, 0.0 }
 0x203   :  { %v191_v32 = vsel %vm137_vm11, %v190_v31, 0.0 }
 0x204   :  { %192 = vadd.xlane.f32.xlu1 %v191_v32 }
 0x230   :  { %v140_v33 = vpop.xlane.xlu1 %139 }
 0x231   :  { %v227_v34 = vsel %vm225_vm14, %v140_v33, 1.0 }
 0x232   :  { %269 = vrcp.f32 %v227_v34 }
 0x23f   :  { %v270_v37 = vpop.eup %269 }
 0x286   :  { %v219_v35 = vpop.xlane.xlu0 %218 }
 0x287   :  { %v226_v36 = vsel %vm225_vm14, %v219_v35, 1.0 }
 0x288   :  { %271 = vlog2.f32 %v226_v36 }
 0x28d   :  { %v193_v38 = vpop.xlane.xlu1 %192 }
 0x28e   :  { %v231_v41 = vmul.f32 %v270_v37, %v193_v38 }
 0x295   :  { %v272_v39 = vpop.eup %271 }
 0x296   :  { %v229_v40 = vmul.f32 0.6931472, %v272_v39 }
 0x298   :  { %v232_v42 = vsub.f32 %v229_v40, %v231_v41 }
 0x29a   :  { %v233_v43 = vsel %vm225_vm14, %v232_v42, 0.0 }
 0x29b   :  { %235 = vst.msk [vmem:[%s388_s3] sm:$0x3] %vm234_vm15, %v233_v43 }
 0x29c   :  { %240 = vsyncpa [#allocation3], 1 }
 0x29d   :  { %241 = vsyncpa [#allocation5], 1 }

</bundles_post_ra>
